<compile_context>
chip_gen: v7x
topology: tpu7x:2x2x1
jax: 0.10.0
libtpu: 0.0.40
codegen_flags: <defaults>
</compile_context>

<pallas_src>
import jax
import jax.numpy as jnp
from jax.experimental import pallas as pl
from jax.experimental.pallas import tpu as pltpu


# ----------------------------------------------------------------------------
# Primary path: zero-copy identity (output HBM buffer aliases the input).
# ----------------------------------------------------------------------------
def _alias_kernel(x_ref, o_ref):
    # The output buffer aliases the input buffer (input_output_aliases={0: 0}),
    # so it already holds x when the kernel starts.  Nothing to move; just mark
    # the aliased output as used so the side-effecting call is preserved.
    del x_ref
    pltpu.touch(o_ref)


def _zero_copy_identity(x):
    return pl.pallas_call(
        _alias_kernel,
        out_shape=jax.ShapeDtypeStruct(x.shape, x.dtype),
        grid=(1,),
        in_specs=[pl.BlockSpec(memory_space=pl.ANY)],
        out_specs=pl.BlockSpec(memory_space=pl.ANY),
        input_output_aliases={0: 0},
        compiler_params=pltpu.CompilerParams(has_side_effects=True),
    )(x)


# Donation is what lets XLA reuse the input HBM buffer for the output; without
# it the aliasing is still correct but costs one defensive copy.
_zero_copy_identity_jit = jax.jit(_zero_copy_identity, donate_argnums=(0,))


# ----------------------------------------------------------------------------
# Fallback path: tiled, lane-dense HBM copy (only used if the zero-copy
# construction is unavailable in the installed Pallas version).
# ----------------------------------------------------------------------------
def _copy_kernel(x_ref, o_ref):
    o_ref[...] = x_ref[...]


# Wider lane-dense widths first: full-width unmasked `vst` stores and fewer DMA
# strides per block.
_WIDTHS = (32768, 16384, 8192, 4096, 2048, 1024, 512, 256, 128)
_TARGET_TILE_BYTES = 8 << 20   # amortizes the ~0.35us per-grid-step overhead
_VMEM_LIMIT_BYTES = 48 << 20   # 8 MiB x 2 bufs x (in+out) = 32 MiB + headroom


def _copy_identity(x):
    orig_shape = x.shape
    total = x.size
    itemsize = jnp.dtype(x.dtype).itemsize

    width = None
    for w in _WIDTHS:
        if total % w == 0:
            width = w
            break

    if width is None:
        # Element count is not a multiple of 128.
        if total * itemsize <= (2 << 20):
            # Small: a single full-extent block (block dims == array dims).
            x2 = x.reshape(1, total)
            y2 = pl.pallas_call(
                _copy_kernel,
                out_shape=jax.ShapeDtypeStruct(x2.shape, x2.dtype),
            )(x2)
            return y2.reshape(orig_shape)
        # Large & irregular: copy the 128-aligned bulk with the tiled kernel,
        # the tiny remainder with a full-extent block, then stitch together.
        flat = x.reshape(total)
        bulk = (total // 128) * 128
        head = _copy_identity(flat[:bulk])
        tail = _copy_identity(flat[bulk:])
        return jnp.concatenate([head, tail]).reshape(orig_shape)

    rows = total // width
    x2 = x.reshape(rows, width)

    max_rows = max(1, _TARGET_TILE_BYTES // (width * itemsize))
    if rows <= max_rows:
        block_rows = rows                      # full extent -> layout rule OK
    else:
        block_rows = max(32, (max_rows // 32) * 32)   # covers f32/bf16/i8 packing
    grid_rows = pl.cdiv(rows, block_rows)

    # v7x has two TensorCores sharing HBM: give the parallel axis >= 2 steps
    # when there is enough work, so both cores issue copy DMAs.
    if grid_rows == 1 and rows >= 64 and total * itemsize >= (1 << 20):
        block_rows = max(32, ((rows // 2) // 32) * 32)
        grid_rows = pl.cdiv(rows, block_rows)

    y2 = pl.pallas_call(
        _copy_kernel,
        out_shape=jax.ShapeDtypeStruct(x2.shape, x2.dtype),
        grid_spec=pltpu.PrefetchScalarGridSpec(
            num_scalar_prefetch=0,
            grid=(grid_rows,),
            in_specs=[pl.BlockSpec((block_rows, width), lambda i: (i, 0))],
            out_specs=pl.BlockSpec((block_rows, width), lambda i: (i, 0)),
        ),
        compiler_params=pltpu.CompilerParams(
            dimension_semantics=("parallel",),
            vmem_limit_bytes=_VMEM_LIMIT_BYTES,
        ),
    )(x2)
    return y2.reshape(orig_shape)


# ----------------------------------------------------------------------------
# Public wrapper.
# ----------------------------------------------------------------------------
_ZERO_COPY_OK = True   # flipped if the zero-copy construction is rejected


def none_layer(x):
    """Pallas implementation of NoneLayer.forward: identity on the input."""
    global _ZERO_COPY_OK
    if x.size == 0:
        return x
    if _ZERO_COPY_OK:
        try:
            return _zero_copy_identity_jit(x)
        except Exception:  # defensive: fall back to the proven tiled copy
            _ZERO_COPY_OK = False
    return _copy_identity(x)


if __name__ == "__main__":
    key = jax.random.PRNGKey(0)
    shape, dtype = (2, 4, 16, 16), jnp.float32
    x = jax.random.normal(key, shape, dtype=dtype)
    # `x` may be donated into the output buffer, so regenerate the expected
    # values from the same key for the comparison.
    expected = jax.random.normal(key, shape, dtype=dtype)

    y = none_layer(x)
    jax.block_until_ready(y)

    assert y.shape == shape and y.dtype == dtype
    assert bool(jnp.all(y == expected))
    print("KERNEL_OK")
</pallas_src>

<mosaic_0001>
module attributes {stable_mosaic.version = 11 : i64} {
  func.func @_alias_kernel(%arg0: i32, %arg1: memref<2x4x16x16xf32, #tpu.memory_space<any>>, %arg2: memref<2x4x16x16xf32, #tpu.memory_space<any>>) attributes {dimension_semantics = [#tpu.dimension_semantics<arbitrary>], iteration_bounds = array<i64: 1>, scalar_prefetch = 0 : i64, scratch_operands = 0 : i64, tpu.core_type = #tpu.core_type<tc>, window_params = [{}, {}]} {
    return
  }
}

module attributes {stable_mosaic.version = 11 : i64} {
  func.func @_copy_kernel(%arg0: i32, %arg1: memref<1x2048xf32, #tpu.memory_space<vmem>>, %arg2: memref<1x2048xf32, #tpu.memory_space<vmem>>) attributes {dimension_semantics = [#tpu.dimension_semantics<parallel>], iteration_bounds = array<i64: 1>, scalar_prefetch = 0 : i64, scratch_operands = 0 : i64, tpu.core_type = #tpu.core_type<tc>, window_params = [{transform_indices = @transform_0, window_bounds = array<i64: 1, 2048>}, {transform_indices = @transform_1, window_bounds = array<i64: 1, 2048>}]} {
    %c0 = arith.constant 0 : index
    %c0_0 = arith.constant 0 : index
    %0 = vector.load %arg1[%c0, %c0_0] : memref<1x2048xf32, #tpu.memory_space<vmem>>, vector<1x2048xf32>
    %c0_1 = arith.constant 0 : index
    %c0_2 = arith.constant 0 : index
    %1 = vector.load %arg2[%c0_1, %c0_2] : memref<1x2048xf32, #tpu.memory_space<vmem>>, vector<1x2048xf32>
    tpu.vector_store %arg2[%c0_1, %c0_2], %0 {strides = array<i32>} : memref<1x2048xf32, #tpu.memory_space<vmem>>, vector<1x2048xf32>,
    return
  }
  func.func @transform_0(%arg0: i32) -> (i32, i32) {
    %c0_i32 = arith.constant 0 : i32
    %c0_i32_0 = arith.constant 0 : i32
    return %arg0, %c0_i32 : i32, i32
  }
  func.func @transform_1(%arg0: i32) -> (i32, i32) {
    %c0_i32 = arith.constant 0 : i32
    %c0_i32_0 = arith.constant 0 : i32
    return %arg0, %c0_i32 : i32, i32
  }
}

</mosaic_0001>

<bundles_post_ra>
// kernel: _zero_copy_identity.1
= control target key start
LH: loop header
LB: loop body
LE: loop exit
PB: predicated region body
PF: predicated region fallthrough
CT: control target
= control target key end

     0   :  { %s16_s0 = inlined_call_operand.hbm [shape: f32[2,4,16,16], index: 0, kind: input, shape index: {}, may-alias: {0,1}]   ;;  %s17_s1 = inlined_call_operand.hbm [shape: f32[2,4,16,16], index: 1, kind: output, shape index: {}, may-alias: {0,1}]  }

// kernel: tpu_custom_call.1
= control target key start
LH: loop header
LB: loop body
LE: loop exit
PB: predicated region body
PF: predicated region fallthrough
CT: control target
= control target key end

     0   :  { %6 = vsyncpa [#allocation3], 0  ;;  %s126_s0 = inlined_call_operand.hbm [shape: f32[1,2048], index: 0, kind: input, shape index: {}]   ;;  %s127_s1 = inlined_call_operand.hbm [shape: f32[1,2048], index: 1, kind: output, shape index: {}]  }
   0x1   :  { %7 = vsyncpa [#allocation4], 0  ;;  %s90_s6 = smov [#allocation2]   ;;  %s42_s10 = scalar_lea.hbm %s126_s0, 256 }
   0x2   :  { %s14_s7 = sshll.u32 %s90_s6, 4  ;;  %p43_p0 = scmp.ne.s32.totalorder %s126_s0, %s42_s10  ;;  %s15_s7 = int_to_ptr.vmem [resolvable:$true] %s14_s7 }
   0x3   :  { %p46_p1 = scmp.lt.u32.totalorder %s42_s10, %s126_s0 }
   0x5   :  { %p48_p2 = pnand %p46_p1, %p43_p0 }
   0x7   :  { %51 = shalt.err (!%p48_p2)
}
   0x8   :  { %s52_s15 = scalar_lea.vmem %s15_s7, 256  ;;  %p57_p4 = scmp.lt.s32.totalorder %s15_s7, %s15_s7 }
   0x9   :  { %p53_p3 = scmp.ne.s32.totalorder %s15_s7, %s52_s15  ;;  %p58_p5 = scmp.lt.s32.totalorder %s52_s15, %s52_s15 }
   0xb   :  { %p59_p6 = por %p58_p5, %p57_p4 }
   0xd   :  { %p60_p7 = pnand %p59_p6, %p53_p3 }
   0xf   :  { %63 = shalt.err (!%p60_p7)
}
  0x10   :  { %17 = dma.hbm_to_vmem [thread:$0]  %s126_s0, 256, %s15_s7, [#allocation3]  }
  0x11   :  { %86 = dma.done.wait [#allocation3], 256  }
  0x12   :  { %87 = vsyncadd [#allocation3], 4294967040  ;;  %s91_s18 = smov [#allocation5]   ;;  %v21_v0 = vld [vmem:[#allocation2] sm:$0xff]  ;;  %v22_v1 = vld [vmem:[#allocation2 + $0x8] sm:$0xff] }
  0x13   :  { %s31_s19 = sshll.u32 %s91_s18, 4  ;;  %23 = vst [vmem:[#allocation5] sm:$0xff] %v21_v0  ;;  %24 = vst [vmem:[#allocation5 + $0x8] sm:$0xff] %v22_v1  ;;  %s32_s19 = int_to_ptr.vmem [resolvable:$true] %s31_s19 }
  0x14   :  { %s64_s20 = scalar_lea.vmem %s32_s19, 256  ;;  %p69_p9 = scmp.lt.s32.totalorder %s32_s19, %s32_s19 }
  0x15   :  { %p65_p8 = scmp.ne.s32.totalorder %s32_s19, %s64_s20  ;;  %p70_p10 = scmp.lt.s32.totalorder %s64_s20, %s64_s20 }
  0x17   :  { %p71_p11 = por %p70_p10, %p69_p9 }
  0x19   :  { %p72_p12 = pnand %p71_p11, %p65_p8 }
  0x1b   :  { %75 = shalt.err (!%p72_p12)
}
  0x1c   :  { %s76_s0 = scalar_lea.hbm %s127_s1, 256 }
  0x1d   :  { %p77_p13 = scmp.ne.s32.totalorder %s127_s1, %s76_s0  ;;  %p80_p0 = scmp.lt.u32.totalorder %s76_s0, %s127_s1 }
  0x1f   :  { %p82_p1 = pnand %p80_p0, %p77_p13 }
  0x21   :  { %85 = shalt.err (!%p82_p1)
}
  0x22   :  { %34 = dma.vmem_to_hbm [thread:$0]  %s32_s19, 256, %s127_s1, [#allocation4]  }
  0x23   :  { %88 = dma.done.wait [#allocation4], 256  }
  0x24   :  { %89 = vsyncadd [#allocation4], 4294967040 }
  0x25   :  { %38 = vsyncpa [#allocation3], 1 }
  0x26   :  { %39 = vsyncpa [#allocation4], 1 }

</bundles_post_ra>
